<compile_context>
chip_gen: v7x
topology: tpu7x:2x2x1
jax: 0.10.0
libtpu: 0.0.40
codegen_flags: <defaults>
</compile_context>

<pallas_src>
import jax
import jax.numpy as jnp
from jax.experimental import pallas as pl
from jax.experimental.pallas import tpu as pltpu


def _round_up(x: int, m: int) -> int:
    return (x + m - 1) // m * m


def _cdiv(a: int, b: int) -> int:
    return -(-a // b)


def _silu(v):
    # Always f32 (v5e has no bf16 VPU/EUP).  exp() runs on the EUP slot.
    # If profiling shows the VALU slot binding on v6e, switch to
    #   v * pl.reciprocal(1.0 + jnp.exp(-v), approx=True)
    # to keep the divide on the EUP as well (costs a little accuracy).
    return v * jax.nn.sigmoid(v)


def _tensorcores_per_chip() -> int:
    """2 for v7x (two TensorCores/chip), else 1.  Best-effort detection."""
    try:
        kind = jax.devices()[0].device_kind.lower()
        if "v7" in kind:
            return 2
    except Exception:
        pass
    return 1


# ----------------------------------------------------------------------------
# Fused kernel builder
# ----------------------------------------------------------------------------
def build_omniward_kernel(n_mid, head_depths, fused_heads, nt_out, na_out,
                          mxu_dtype):
    """Kernel ref order:
       x (concat'd input),
       (w, b) * n_mid middle layers,
       (w, b) * head layers (fused, or traj-then-act),
       out (batch_tile, out_pad)
    """

    def dot(a, w_ref):
        # Optional bf16 operands, always f32 MXU accumulation.
        return jnp.dot(a.astype(mxu_dtype), w_ref[...],
                       preferred_element_type=jnp.float32)

    def kernel(*refs):
        x_ref = refs[0]
        idx = 1

        def take_pairs(n):
            nonlocal idx
            pairs = []
            for _ in range(n):
                pairs.append((refs[idx], refs[idx + 1]))
                idx += 2
            return pairs

        mid_layers = take_pairs(n_mid)
        if fused_heads:
            head_layers = take_pairs(head_depths[0])
        else:
            traj_layers = take_pairs(head_depths[0])
            act_layers = take_pairs(head_depths[1])
        out_ref = refs[idx]

        # ---- middle encoder: single K=d_in dot per layer ----
        h = x_ref[...]
        for w_ref, b_ref in mid_layers:
            h = _silu(dot(h, w_ref) + b_ref[...])

        # ---- heads ----
        if fused_heads:
            # One wide matmul per level (concat / block-diagonal weights built
            # at trace time); last level is already padded to 128 lanes, so the
            # final store is a single unmasked vst.
            out = h
            n_head = head_depths[0]
            for i, (w_ref, b_ref) in enumerate(head_layers):
                out = dot(out, w_ref) + b_ref[...]
                if i < n_head - 1:
                    out = _silu(out)
            out_ref[...] = out.astype(out_ref.dtype)
        else:
            # Unequal-depth fallback: zero the output tile once, then write the
            # two heads into disjoint static lane ranges (no in-kernel concat,
            # no in-kernel padding; HBM writeback stays a full-tile DMA).
            out_ref[...] = jnp.zeros_like(out_ref)
            nt, na = head_depths
            t = h
            for i, (w_ref, b_ref) in enumerate(traj_layers):
                t = dot(t, w_ref) + b_ref[...]
                if i < nt - 1:
                    t = _silu(t)
            a = h
            for i, (w_ref, b_ref) in enumerate(act_layers):
                a = dot(a, w_ref) + b_ref[...]
                if i < na - 1:
                    a = _silu(a)
            out_ref[:, 0:nt_out] = t.astype(out_ref.dtype)
            out_ref[:, nt_out:nt_out + na_out] = a.astype(out_ref.dtype)

    return kernel


# ----------------------------------------------------------------------------
# Wrapper
# ----------------------------------------------------------------------------
def omniward_forward(state, contr_params, waypoints, centerline, left_bound,
                     right_bound, params, *, batch_tile=2048,
                     mxu_dtype=jnp.bfloat16, out_dtype=jnp.float32):
    """params = dict with lists of (w, b) for 'mid', 'traj', 'act'.

    w: (in, out) == torch weight.T, b: (1, out).
    mxu_dtype=bfloat16 (default) uses bf16 MXU operands with f32 accumulation;
    pass jnp.float32 for bit-strict (1e-5) agreement with the f32 reference.
    """
    del centerline, left_bound, right_bound  # unused by the forward pass

    mid, traj, act = params["mid"], params["traj"], params["act"]
    nt_out = traj[-1][0].shape[1]
    na_out = act[-1][0].shape[1]

    # Fold torch.cat into the wrapper: one K=d_in dot in the kernel instead of
    # three tiny-K dots (MXU pushes are K-independent for K<=128).
    x = jnp.concatenate([state, contr_params, waypoints], axis=1)
    B, d_in = x.shape

    # ------------------------------------------------------------------
    # Trace-time head fusion (in production, pre-fuse once offline).
    # ------------------------------------------------------------------
    fused_heads = len(traj) == len(act)
    out_width = nt_out + na_out
    out_pad = _round_up(max(out_width, 128), 128)   # lane-dense output slab

    if fused_heads:
        head_pairs = []
        for i, ((wt, bt), (wa, ba)) in enumerate(zip(traj, act)):
            if i == 0:
                w = jnp.concatenate([wt, wa], axis=1)          # shared input h
            else:
                it_, ot_ = wt.shape
                ia_, oa_ = wa.shape
                w = jnp.zeros((it_ + ia_, ot_ + oa_), wt.dtype)
                w = w.at[:it_, :ot_].set(wt).at[it_:, ot_:].set(wa)
            b = jnp.concatenate([bt, ba], axis=1)
            head_pairs.append([w, b])
        # Zero-pad the final projection to `out_pad` lanes so the output store
        # is a single unmasked vst.
        lw, lb = head_pairs[-1]
        pad = out_pad - lw.shape[1]
        if pad:
            lw = jnp.pad(lw, ((0, 0), (0, pad)))
            lb = jnp.pad(lb, ((0, 0), (0, pad)))
        head_pairs[-1] = [lw, lb]
        head_depths = (len(head_pairs),)
    else:
        # TODO(synk): heads with unequal depth are not fused (separate loops).
        head_pairs = list(traj) + list(act)
        head_depths = (len(traj), len(act))

    def cast_w(w):
        return w.astype(mxu_dtype) if mxu_dtype != jnp.float32 else w

    param_arrays = []
    for w, b in list(mid) + list(head_pairs):
        param_arrays += [cast_w(w), b]          # biases stay f32

    # ------------------------------------------------------------------
    # Batch tiling: derive the tile from B so row padding is minimal (<=7
    # rows), tile rows are a multiple of 8 (sublane rule), and chips with two
    # TensorCores keep >=2 grid steps to shard across.
    # ------------------------------------------------------------------
    n_steps = max(1, _cdiv(B, int(batch_tile)))
    if _tensorcores_per_chip() >= 2 and B > 8:
        n_steps = max(n_steps, 2)
    tb = _round_up(_cdiv(B, n_steps), 8)
    bp = _round_up(B, tb)
    xp = x if bp == B else jnp.pad(x, ((0, bp - B), (0, 0)))
    grid = (bp // tb,)

    x_spec = pl.BlockSpec((tb, d_in), lambda i: (i, 0))
    # Weights/biases: full-array blocks with a constant index_map, so they are
    # DMA'd once and stay VMEM-resident across all batch-grid iterations.
    w_specs = [pl.BlockSpec(p.shape, lambda i: (0, 0)) for p in param_arrays]
    out_spec = pl.BlockSpec((tb, out_pad), lambda i: (i, 0))
    out_shape = jax.ShapeDtypeStruct((bp, out_pad), out_dtype)

    # ------------------------------------------------------------------
    # Cost estimate (advisory, lets XLA schedule around the custom call).
    # ------------------------------------------------------------------
    layer_dims = [w.shape for w, _ in mid] + [w.shape for w, _ in head_pairs]
    flops = 2 * bp * sum(int(i) * int(o) for i, o in layer_dims)
    silu_widths = [w.shape[1] for w, _ in mid]
    if fused_heads:
        silu_widths += [w.shape[1] for w, _ in head_pairs[:-1]]
    else:
        silu_widths += [w.shape[1] for w, _ in traj[:-1]]
        silu_widths += [w.shape[1] for w, _ in act[:-1]]
    transcendentals = bp * sum(int(s) for s in silu_widths)
    bytes_accessed = (x.dtype.itemsize * bp * d_in
                      + jnp.dtype(out_dtype).itemsize * bp * out_pad
                      + sum(int(p.size) * p.dtype.itemsize
                            for p in param_arrays))

    kernel = build_omniward_kernel(len(mid), head_depths, fused_heads,
                                   nt_out, na_out, mxu_dtype)

    out = pl.pallas_call(
        kernel,
        out_shape=out_shape,
        grid=grid,
        in_specs=[x_spec] + w_specs,
        out_specs=out_spec,
        compiler_params=pltpu.CompilerParams(
            dimension_semantics=("parallel",),      # megacore / v7x 2-TC split
            vmem_limit_bytes=32 * 1024 * 1024,
        ),
        cost_estimate=pl.CostEstimate(
            flops=flops,
            transcendentals=transcendentals,
            bytes_accessed=bytes_accessed,
        ),
    )(xp, *param_arrays)

    traj_pred = out[:B, :nt_out].astype(jnp.float32)
    act_pred = out[:B, nt_out:nt_out + na_out].astype(jnp.float32)
    return {"trajectory_pred": traj_pred, "actuators_pred": act_pred}


# ----------------------------------------------------------------------------
# Deterministic parameter construction (synthetic; no checkpoint load)
# ----------------------------------------------------------------------------
def make_linear_params(key, sizes):
    """List of (w, b) with w: (in, out) == torch weight.T, b: (1, out)."""
    layers = []
    for in_f, out_f in zip(sizes[:-1], sizes[1:]):
        key, kw, kb = jax.random.split(key, 3)
        bound = 1.0 / jnp.sqrt(in_f)
        w = jax.random.uniform(kw, (in_f, out_f), jnp.float32, -bound, bound)
        b = jax.random.uniform(kb, (1, out_f), jnp.float32, -bound, bound)
        layers.append((w, b))
    return key, layers


def reference_forward(state, contr_params, waypoints, params):
    """Pure-JAX reference replicating the PyTorch semantics."""
    x = jnp.concatenate([state, contr_params, waypoints], axis=1)
    h = x
    for w, b in params["mid"]:
        h = jax.nn.silu(h @ w + b)
    t = h
    for i, (w, b) in enumerate(params["traj"]):
        t = t @ w + b
        if i < len(params["traj"]) - 1:
            t = jax.nn.silu(t)
    a = h
    for i, (w, b) in enumerate(params["act"]):
        a = a @ w + b
        if i < len(params["act"]) - 1:
            a = jax.nn.silu(a)
    return {"trajectory_pred": t, "actuators_pred": a}


if __name__ == "__main__":
    # Small, forward-consistent shapes.
    state_dim, contr_dim, wpts_dim = 6, 5, 21          # concat -> 32
    middle_sizes = [state_dim + contr_dim + wpts_dim, 32, 32]
    trajectory_head_sizes = [32, 32, 30]               # 5 future pts x FULL_TRAJ_DIM=6
    actuators_head_sizes = [32, 32, 4]

    key = jax.random.PRNGKey(0)
    key, mid_params = make_linear_params(key, middle_sizes)
    key, traj_params = make_linear_params(key, trajectory_head_sizes)
    key, act_params = make_linear_params(key, actuators_head_sizes)
    params = {"mid": mid_params, "traj": traj_params, "act": act_params}

    def make_inputs(key, batch):
        key, k1, k2, k3, k4, k5, k6 = jax.random.split(key, 7)
        return key, dict(
            state=jax.random.normal(k1, (batch, state_dim), jnp.float32),
            contr_params=jax.random.normal(k2, (batch, contr_dim), jnp.float32),
            waypoints=jax.random.normal(k3, (batch, wpts_dim), jnp.float32),
            centerline=jax.random.normal(k4, (batch, 20, 2), jnp.float32),
            left_bound=jax.random.normal(k5, (batch, 20, 2), jnp.float32),
            right_bound=jax.random.normal(k6, (batch, 20, 2), jnp.float32),
        )

    def check(batch, batch_tile, mxu_dtype, atol, rtol):
        global key
        key, inp = make_inputs(key, batch)
        out = omniward_forward(inp["state"], inp["contr_params"],
                               inp["waypoints"], inp["centerline"],
                               inp["left_bound"], inp["right_bound"], params,
                               batch_tile=batch_tile, mxu_dtype=mxu_dtype)
        jax.block_until_ready(out)
        ref = reference_forward(inp["state"], inp["contr_params"],
                                inp["waypoints"], params)
        assert out["trajectory_pred"].shape == (batch, trajectory_head_sizes[-1])
        assert out["actuators_pred"].shape == (batch, actuators_head_sizes[-1])
        assert jnp.allclose(out["trajectory_pred"], ref["trajectory_pred"],
                            atol=atol, rtol=rtol)
        assert jnp.allclose(out["actuators_pred"], ref["actuators_pred"],
                            atol=atol, rtol=rtol)

    # Strict f32 MXU path (bit-level agreement with the reference).
    check(batch=2, batch_tile=2048, mxu_dtype=jnp.float32, atol=1e-5, rtol=1e-5)
    check(batch=600, batch_tile=2048, mxu_dtype=jnp.float32, atol=1e-5, rtol=1e-5)
    # Multi-step batch grid (B=600, tb=200 -> zero row padding).
    check(batch=600, batch_tile=256, mxu_dtype=jnp.float32, atol=1e-5, rtol=1e-5)
    # Default bf16-MXU path (relaxed tolerance expected for bf16 operands).
    check(batch=600, batch_tile=2048, mxu_dtype=jnp.bfloat16, atol=1e-1, rtol=1e-1)

    print("KERNEL_OK")
</pallas_src>

<mosaic_0001>
module attributes {stable_mosaic.version = 11 : i64} {
  func.func @kernel(%arg0: i32, %arg1: memref<8x32xf32, #tpu.memory_space<vmem>>, %arg2: memref<32x32xf32, #tpu.memory_space<vmem>>, %arg3: memref<1x32xf32, #tpu.memory_space<vmem>>, %arg4: memref<32x32xf32, #tpu.memory_space<vmem>>, %arg5: memref<1x32xf32, #tpu.memory_space<vmem>>, %arg6: memref<32x64xf32, #tpu.memory_space<vmem>>, %arg7: memref<1x64xf32, #tpu.memory_space<vmem>>, %arg8: memref<64x128xf32, #tpu.memory_space<vmem>>, %arg9: memref<1x128xf32, #tpu.memory_space<vmem>>, %arg10: memref<8x128xf32, #tpu.memory_space<vmem>>) attributes {dimension_semantics = [#tpu.dimension_semantics<parallel>], iteration_bounds = array<i64: 1>, scalar_prefetch = 0 : i64, scratch_operands = 0 : i64, tpu.core_type = #tpu.core_type<tc>, window_params = [{transform_indices = @transform_0, window_bounds = array<i64: 8, 32>}, {pipeline_mode = #tpu.pipeline_mode<synchronous>, transform_indices = @transform_1, window_bounds = array<i64: 32, 32>}, {pipeline_mode = #tpu.pipeline_mode<synchronous>, transform_indices = @transform_2, window_bounds = array<i64: 1, 32>}, {pipeline_mode = #tpu.pipeline_mode<synchronous>, transform_indices = @transform_3, window_bounds = array<i64: 32, 32>}, {pipeline_mode = #tpu.pipeline_mode<synchronous>, transform_indices = @transform_4, window_bounds = array<i64: 1, 32>}, {pipeline_mode = #tpu.pipeline_mode<synchronous>, transform_indices = @transform_5, window_bounds = array<i64: 32, 64>}, {pipeline_mode = #tpu.pipeline_mode<synchronous>, transform_indices = @transform_6, window_bounds = array<i64: 1, 64>}, {pipeline_mode = #tpu.pipeline_mode<synchronous>, transform_indices = @transform_7, window_bounds = array<i64: 64, 128>}, {pipeline_mode = #tpu.pipeline_mode<synchronous>, transform_indices = @transform_8, window_bounds = array<i64: 1, 128>}, {transform_indices = @transform_9, window_bounds = array<i64: 8, 128>}]} {
    %c0 = arith.constant 0 : index
    %c0_0 = arith.constant 0 : index
    %0 = vector.load %arg1[%c0, %c0_0] : memref<8x32xf32, #tpu.memory_space<vmem>>, vector<8x32xf32>
    %c0_1 = arith.constant 0 : index
    %c0_2 = arith.constant 0 : index
    %1 = vector.load %arg2[%c0_1, %c0_2] : memref<32x32xf32, #tpu.memory_space<vmem>>, vector<32x32xf32>
    %cst = arith.constant dense<0.000000e+00> : vector<8x32xf32>
    %2 = tpu.matmul %0, %1, %cst {dimension_numbers = #tpu.dot_dimension_numbers<[1], [0], [0], [1], [0, 0, 1, 1], [], []>} : vector<8x32xf32>, vector<32x32xf32>, vector<8x32xf32> -> vector<8x32xf32>
    %c0_3 = arith.constant 0 : index
    %c0_4 = arith.constant 0 : index
    %3 = vector.load %arg3[%c0_3, %c0_4] : memref<1x32xf32, #tpu.memory_space<vmem>>, vector<1x32xf32>
    %4 = vector.broadcast %3 : vector<1x32xf32> to vector<8x32xf32>
    %5 = arith.addf %2, %4 : vector<8x32xf32>
    %6 = arith.negf %5 : vector<8x32xf32>
    %7 = math.exp %6 : vector<8x32xf32>
    %cst_5 = arith.constant 1.000000e+00 : f32
    %8 = vector.broadcast %cst_5 : f32 to vector<8x32xf32>
    %9 = arith.addf %8, %7 : vector<8x32xf32>
    %10 = arith.divf %8, %9 : vector<8x32xf32>
    %11 = arith.mulf %5, %10 : vector<8x32xf32>
    %c0_6 = arith.constant 0 : index
    %c0_7 = arith.constant 0 : index
    %12 = vector.load %arg4[%c0_6, %c0_7] : memref<32x32xf32, #tpu.memory_space<vmem>>, vector<32x32xf32>
    %cst_8 = arith.constant dense<0.000000e+00> : vector<8x32xf32>
    %13 = tpu.matmul %11, %12, %cst_8 {dimension_numbers = #tpu.dot_dimension_numbers<[1], [0], [0], [1], [0, 0, 1, 1], [], []>} : vector<8x32xf32>, vector<32x32xf32>, vector<8x32xf32> -> vector<8x32xf32>
    %c0_9 = arith.constant 0 : index
    %c0_10 = arith.constant 0 : index
    %14 = vector.load %arg5[%c0_9, %c0_10] : memref<1x32xf32, #tpu.memory_space<vmem>>, vector<1x32xf32>
    %15 = vector.broadcast %14 : vector<1x32xf32> to vector<8x32xf32>
    %16 = arith.addf %13, %15 : vector<8x32xf32>
    %17 = arith.negf %16 : vector<8x32xf32>
    %18 = math.exp %17 : vector<8x32xf32>
    %cst_11 = arith.constant 1.000000e+00 : f32
    %19 = vector.broadcast %cst_11 : f32 to vector<8x32xf32>
    %20 = arith.addf %19, %18 : vector<8x32xf32>
    %21 = arith.divf %19, %20 : vector<8x32xf32>
    %22 = arith.mulf %16, %21 : vector<8x32xf32>
    %c0_12 = arith.constant 0 : index
    %c0_13 = arith.constant 0 : index
    %23 = vector.load %arg6[%c0_12, %c0_13] : memref<32x64xf32, #tpu.memory_space<vmem>>, vector<32x64xf32>
    %cst_14 = arith.constant dense<0.000000e+00> : vector<8x64xf32>
    %24 = tpu.matmul %22, %23, %cst_14 {dimension_numbers = #tpu.dot_dimension_numbers<[1], [0], [0], [1], [0, 0, 1, 1], [], []>} : vector<8x32xf32>, vector<32x64xf32>, vector<8x64xf32> -> vector<8x64xf32>
    %c0_15 = arith.constant 0 : index
    %c0_16 = arith.constant 0 : index
    %25 = vector.load %arg7[%c0_15, %c0_16] : memref<1x64xf32, #tpu.memory_space<vmem>>, vector<1x64xf32>
    %26 = vector.broadcast %25 : vector<1x64xf32> to vector<8x64xf32>
    %27 = arith.addf %24, %26 : vector<8x64xf32>
    %28 = arith.negf %27 : vector<8x64xf32>
    %29 = math.exp %28 : vector<8x64xf32>
    %cst_17 = arith.constant 1.000000e+00 : f32
    %30 = vector.broadcast %cst_17 : f32 to vector<8x64xf32>
    %31 = arith.addf %30, %29 : vector<8x64xf32>
    %32 = arith.divf %30, %31 : vector<8x64xf32>
    %33 = arith.mulf %27, %32 : vector<8x64xf32>
    %c0_18 = arith.constant 0 : index
    %c0_19 = arith.constant 0 : index
    %34 = vector.load %arg8[%c0_18, %c0_19] : memref<64x128xf32, #tpu.memory_space<vmem>>, vector<64x128xf32>
    %cst_20 = arith.constant dense<0.000000e+00> : vector<8x128xf32>
    %35 = tpu.matmul %33, %34, %cst_20 {dimension_numbers = #tpu.dot_dimension_numbers<[1], [0], [0], [1], [0, 0, 1, 1], [], []>} : vector<8x64xf32>, vector<64x128xf32>, vector<8x128xf32> -> vector<8x128xf32>
    %c0_21 = arith.constant 0 : index
    %c0_22 = arith.constant 0 : index
    %36 = vector.load %arg9[%c0_21, %c0_22] : memref<1x128xf32, #tpu.memory_space<vmem>>, vector<1x128xf32>
    %37 = vector.broadcast %36 : vector<1x128xf32> to vector<8x128xf32>
    %38 = arith.addf %35, %37 : vector<8x128xf32>
    %c0_23 = arith.constant 0 : index
    %c0_24 = arith.constant 0 : index
    %39 = vector.load %arg10[%c0_23, %c0_24] : memref<8x128xf32, #tpu.memory_space<vmem>>, vector<8x128xf32>
    tpu.vector_store %arg10[%c0_23, %c0_24], %38 {strides = array<i32>} : memref<8x128xf32, #tpu.memory_space<vmem>>, vector<8x128xf32>,
    return
  }
  func.func @transform_0(%arg0: i32) -> (i32, i32) {
    %c0_i32 = arith.constant 0 : i32
    %c0_i32_0 = arith.constant 0 : i32
    return %arg0, %c0_i32 : i32, i32
  }
  func.func @transform_1(%arg0: i32) -> (i32, i32) {
    %c0_i32 = arith.constant 0 : i32
    %c0_i32_0 = arith.constant 0 : i32
    %c0_i32_1 = arith.constant 0 : i32
    return %c0_i32, %c0_i32_0 : i32, i32
  }
  func.func @transform_2(%arg0: i32) -> (i32, i32) {
    %c0_i32 = arith.constant 0 : i32
    %c0_i32_0 = arith.constant 0 : i32
    %c0_i32_1 = arith.constant 0 : i32
    return %c0_i32, %c0_i32_0 : i32, i32
  }
  func.func @transform_3(%arg0: i32) -> (i32, i32) {
    %c0_i32 = arith.constant 0 : i32
    %c0_i32_0 = arith.constant 0 : i32
    %c0_i32_1 = arith.constant 0 : i32
    return %c0_i32, %c0_i32_0 : i32, i32
  }
  func.func @transform_4(%arg0: i32) -> (i32, i32) {
    %c0_i32 = arith.constant 0 : i32
    %c0_i32_0 = arith.constant 0 : i32
    %c0_i32_1 = arith.constant 0 : i32
    return %c0_i32, %c0_i32_0 : i32, i32
  }
  func.func @transform_5(%arg0: i32) -> (i32, i32) {
    %c0_i32 = arith.constant 0 : i32
    %c0_i32_0 = arith.constant 0 : i32
    %c0_i32_1 = arith.constant 0 : i32
    return %c0_i32, %c0_i32_0 : i32, i32
  }
  func.func @transform_6(%arg0: i32) -> (i32, i32) {
    %c0_i32 = arith.constant 0 : i32
    %c0_i32_0 = arith.constant 0 : i32
    %c0_i32_1 = arith.constant 0 : i32
    return %c0_i32, %c0_i32_0 : i32, i32
  }
  func.func @transform_7(%arg0: i32) -> (i32, i32) {
    %c0_i32 = arith.constant 0 : i32
    %c0_i32_0 = arith.constant 0 : i32
    %c0_i32_1 = arith.constant 0 : i32
    return %c0_i32, %c0_i32_0 : i32, i32
  }
  func.func @transform_8(%arg0: i32) -> (i32, i32) {
    %c0_i32 = arith.constant 0 : i32
    %c0_i32_0 = arith.constant 0 : i32
    %c0_i32_1 = arith.constant 0 : i32
    return %c0_i32, %c0_i32_0 : i32, i32
  }
  func.func @transform_9(%arg0: i32) -> (i32, i32) {
    %c0_i32 = arith.constant 0 : i32
    %c0_i32_0 = arith.constant 0 : i32
    return %arg0, %c0_i32 : i32, i32
  }
}

</mosaic_0001>

<bundles_post_ra>
// kernel: tpu_custom_call.1
= control target key start
LH: loop header
LB: loop body
LE: loop exit
PB: predicated region body
PF: predicated region fallthrough
CT: control target
= control target key end

     0   :  { %14 = vsyncpa [#allocation3], 0  ;;  %s935_s0 = inlined_call_operand.hbm [shape: f32[8,32], index: 0, kind: input, shape index: {}]   ;;  %s936_s1 = inlined_call_operand.hbm [shape: f32[32,32], index: 1, kind: input, shape index: {}]   ;;  %s937_s2 = inlined_call_operand.vmem [shape: f32[1,32], index: 2, kind: input, shape index: {}]   ;;  %s938_s3 = inlined_call_operand.hbm [shape: f32[32,32], index: 3, kind: input, shape index: {}]   ;;  %s939_s4 = inlined_call_operand.vmem [shape: f32[1,32], index: 4, kind: input, shape index: {}]   ;;  %s940_s5 = inlined_call_operand.hbm [shape: f32[32,64], index: 5, kind: input, shape index: {}]   ;;  %s941_s6 = inlined_call_operand.vmem [shape: f32[1,64], index: 6, kind: input, shape index: {}]   ;;  %s942_s7 = inlined_call_operand.hbm [shape: f32[64,128], index: 7, kind: input, shape index: {}]   ;;  %s943_s8 = inlined_call_operand.vmem [shape: f32[1,128], index: 8, kind: input, shape index: {}]   ;;  %s944_s9 = inlined_call_operand.hbm [shape: f32[8,128], index: 9, kind: output, shape index: {}]  }
   0x1   :  { %15 = vsyncpa [#allocation6], 0 }
   0x2   :  { %16 = vsyncpa [#allocation9], 0 }
   0x3   :  { %17 = vsyncpa [#allocation4], 0  ;;  %s761_s30 = smov [#allocation5]   ;;  %s621_s13 = scalar_lea.hbm %s936_s1, 512 }
   0x4   :  { %s33_s10 = sshll.u32 %s761_s30, 4  ;;  %p622_p0 = scmp.ne.s32.totalorder %s936_s1, %s621_s13  ;;  %s34_s10 = int_to_ptr.vmem [resolvable:$true] %s33_s10 }
   0x5   :  { %p625_p1 = scmp.lt.u32.totalorder %s621_s13, %s936_s1 }
   0x7   :  { %p627_p2 = pnand %p625_p1, %p622_p0 }
   0x9   :  { %630 = shalt.err (!%p627_p2)
}
   0xa   :  { %s631_s18 = scalar_lea.vmem %s34_s10, 512  ;;  %p636_p4 = scmp.lt.s32.totalorder %s34_s10, %s34_s10 }
   0xb   :  { %p632_p3 = scmp.ne.s32.totalorder %s34_s10, %s631_s18  ;;  %p637_p5 = scmp.lt.s32.totalorder %s631_s18, %s631_s18 }
   0xd   :  { %p638_p6 = por %p637_p5, %p636_p4 }
   0xf   :  { %p639_p7 = pnand %p638_p6, %p632_p3 }
  0x11   :  { %642 = shalt.err (!%p639_p7)
}
  0x12   :  { %s762_s19 = smov 128   ;;  %s763_s20 = smov 8  }
  0x13   :  { %39 = dma.hbm_to_vmem [thread:$0]  %s936_s1, 512, %s34_s10, [#allocation6], %s762_s19, %s762_s19, %s763_s20  }
  0x14   :  { %s764_s23 = smov [#allocation8]   ;;  %s765_s25 = smov [#allocation2]  }
  0x15   :  { %s61_s24 = sshll.u32 %s764_s23, 4  ;;  %s24_s26 = sshll.u32 %s765_s25, 4  ;;  %s62_s24 = int_to_ptr.vmem [resolvable:$true] %s61_s24  ;;  %s25_s26 = int_to_ptr.vmem [resolvable:$true] %s24_s26 }
  0x16   :  { %s643_s29 = scalar_lea.hbm %s940_s5, 512 }
  0x17   :  { %p644_p8 = scmp.ne.s32.totalorder %s940_s5, %s643_s29  ;;  %p647_p9 = scmp.lt.u32.totalorder %s643_s29, %s940_s5 }
  0x19   :  { %p649_p10 = pnand %p647_p9, %p644_p8 }
  0x1b   :  { %652 = shalt.err (!%p649_p10)
}
  0x1c   :  { %s653_s1 = scalar_lea.vmem %s62_s24, 512  ;;  %p658_p12 = scmp.lt.s32.totalorder %s62_s24, %s62_s24 }
  0x1d   :  { %p654_p11 = scmp.ne.s32.totalorder %s62_s24, %s653_s1  ;;  %p659_p13 = scmp.lt.s32.totalorder %s653_s1, %s653_s1 }
  0x1f   :  { %p660_p0 = por %p659_p13, %p658_p12 }
  0x21   :  { %p661_p1 = pnand %p660_p0, %p654_p11 }
  0x23   :  { %664 = shalt.err (!%p661_p1)
}
  0x24   :  { %67 = dma.hbm_to_vmem [thread:$0]  %s940_s5, 512, %s62_s24, [#allocation9], %s762_s19, %s762_s19, %s763_s20  }
  0x25   :  { %s665_s17 = scalar_lea.hbm %s935_s0, 128 }
  0x26   :  { %p666_p2 = scmp.ne.s32.totalorder %s935_s0, %s665_s17  ;;  %p669_p3 = scmp.lt.u32.totalorder %s665_s17, %s935_s0 }
  0x28   :  { %p671_p4 = pnand %p669_p3, %p666_p2 }
  0x2a   :  { %674 = shalt.err (!%p671_p4)
}
  0x2b   :  { %s675_s25 = scalar_lea.vmem %s25_s26, 128  ;;  %p680_p6 = scmp.lt.s32.totalorder %s25_s26, %s25_s26 }
  0x2c   :  { %p676_p5 = scmp.ne.s32.totalorder %s25_s26, %s675_s25  ;;  %p681_p7 = scmp.lt.s32.totalorder %s675_s25, %s675_s25 }
  0x2e   :  { %p682_p8 = por %p681_p7, %p680_p6 }
  0x30   :  { %p683_p9 = pnand %p682_p8, %p676_p5 }
  0x32   :  { %686 = shalt.err (!%p683_p9)
}
  0x33   :  { %27 = dma.hbm_to_vmem [thread:$0]  %s935_s0, 128, %s25_s26, [#allocation3]  }
  0x34   :  { %s766_s27 = smov [#allocation7]   ;;  %s767_s29 = smov [#allocation10]  }
  0x35   :  { %s47_s28 = sshll.u32 %s766_s27, 4  ;;  %s75_s30 = sshll.u32 %s767_s29, 4  ;;  %s48_s28 = int_to_ptr.vmem [resolvable:$true] %s47_s28  ;;  %s76_s30 = int_to_ptr.vmem [resolvable:$true] %s75_s30 }
  0x36   :  { %s687_s13 = scalar_lea.hbm %s938_s3, 512 }
  0x37   :  { %p688_p10 = scmp.ne.s32.totalorder %s938_s3, %s687_s13  ;;  %p691_p11 = scmp.lt.u32.totalorder %s687_s13, %s938_s3 }
  0x39   :  { %p693_p12 = pnand %p691_p11, %p688_p10 }
  0x3b   :  { %696 = shalt.err (!%p693_p12)
}
  0x3c   :  { %s697_s0 = scalar_lea.vmem %s48_s28, 512  ;;  %p702_p0 = scmp.lt.s32.totalorder %s48_s28, %s48_s28 }
  0x3d   :  { %p698_p13 = scmp.ne.s32.totalorder %s48_s28, %s697_s0  ;;  %p703_p1 = scmp.lt.s32.totalorder %s697_s0, %s697_s0 }
  0x3f   :  { %p704_p2 = por %p703_p1, %p702_p0 }
  0x41   :  { %p705_p3 = pnand %p704_p2, %p698_p13 }
  0x43   :  { %708 = shalt.err (!%p705_p3)
}
  0x44   :  { %53 = dma.hbm_to_vmem [thread:$0]  %s938_s3, 512, %s48_s28, [#allocation6], %s762_s19, %s762_s19, %s763_s20  }
  0x45   :  { %s709_s21 = scalar_lea.hbm %s942_s7, 1024 }
  0x46   :  { %p710_p4 = scmp.ne.s32.totalorder %s942_s7, %s709_s21  ;;  %p713_p5 = scmp.lt.u32.totalorder %s709_s21, %s942_s7 }
  0x48   :  { %p715_p6 = pnand %p713_p5, %p710_p4 }
  0x4a   :  { %718 = shalt.err (!%p715_p6)
}
  0x4b   :  { %s719_s24 = scalar_lea.vmem %s76_s30, 1024  ;;  %p724_p8 = scmp.lt.s32.totalorder %s76_s30, %s76_s30 }
  0x4c   :  { %p720_p7 = scmp.ne.s32.totalorder %s76_s30, %s719_s24  ;;  %p725_p9 = scmp.lt.s32.totalorder %s719_s24, %s719_s24 }
  0x4e   :  { %p726_p10 = por %p725_p9, %p724_p8 }
  0x50   :  { %p727_p11 = pnand %p726_p10, %p720_p7 }
  0x52   :  { %730 = shalt.err (!%p727_p11)
}
  0x53   :  { %81 = dma.hbm_to_vmem [thread:$0]  %s942_s7, 1024, %s76_s30, [#allocation9], %s762_s19, %s762_s19, %s763_s20  }
  0x54   :  { %753 = dma.done.wait [#allocation3], 128  }
  0x55   :  { %754 = vsyncadd [#allocation3], 4294967168 }
  0x56   :  { %755 = dma.done.wait [#allocation6], 1024  }
  0x57   :  { %756 = vsyncadd [#allocation6], 4294966272 }
  0x58   :  { %757 = dma.done.wait [#allocation9], 1536  }
  0x59   :  { %758 = vsyncadd [#allocation9], 4294965760  ;;  %v768_v0 = vmov 0.0|0.0   ;;  %vm769_vm0 = vmmov 0   ;;  %v770_v1 = vmov 0.0   ;;  %v100_v2 = vld [vmem:[#allocation5] sm:$0xff] }
  0x5a   :  { %568 = vmatprep.subr.bf16.mxu0 %v768_v0  ;;  %524 = vmatprep.mubr.msk.f32.mxu0 %vm769_vm0, %v770_v1  ;;  %v101_v3 = vld [vmem:[#allocation5 + $0x8] sm:$0xff]  ;;  %v102_v4 = vld [vmem:[#allocation5 + $0x10] sm:$0xff]  ;;  %v103_v6 = vld [vmem:[#allocation5 + $0x18] sm:$0xff]  ;;  %vm111_vm1 = vcmask 261120   ;;  %vm389_vm2 = vcmask 523264   ;;  %s771_s11 = smov [#allocation11]  }
  0x5b   :  { %574 = vmatprep.subr.bf16.mxu1 %v768_v0  ;;  %535 = vmatprep.mubr.msk.f32.mxu1 %vm769_vm0, %v770_v1  ;;  %v569_v5 = vpack.c.bf16 %v101_v3, %v100_v2  ;;  %v572_v7 = vpack.c.bf16 %v103_v6, %v102_v4  ;;  %v99_v8 = vld [vmem:[#allocation2] sm:$0xff]  ;;  %v192_v9 = vld [vmem:[#allocation7] sm:$0xff]  ;;  %v193_v10 = vld [vmem:[#allocation7 + $0x8] sm:$0xff]  ;;  %s470_s12 = sshll.u32 %s771_s11, 4  ;;  %s471_s12 = int_to_ptr.vmem [resolvable:$true] %s470_s12 }
  0x5c   :  { %v575_v11 = vpack.c.bf16 %v193_v10, %v192_v9  ;;  %v194_v12 = vld [vmem:[#allocation7 + $0x10] sm:$0xff]  ;;  %v195_v13 = vld [vmem:[#allocation7 + $0x18] sm:$0xff]  ;;  %v283_v24 = vld [vmem:[#allocation8] sm:$0xff]  ;;  %p736_p13 = scmp.lt.s32.totalorder %s471_s12, %s471_s12 }
  0x5d   :  { %570 = vmatpush3.bf16.msra.mxu0 %v569_v5  ;;  %v578_v14 = vpack.c.bf16 %v195_v13, %v194_v12  ;;  %v481_v15 = vld [vmem:[%s937_s2] ss:$0 sm:$0xff]  ;;  %v284_v25 = vld [vmem:[#allocation8 + $0x8] sm:$0xff]  ;;  %v285_v27 = vld [vmem:[#allocation8 + $0x10] sm:$0xff] }
  0x5e   :  { %571 = vmatprep.subr.bf16.mxu0 %v768_v0  ;;  %576 = vmatpush3.bf16.msra.mxu1 %v575_v11  ;;  %v581_v26 = vpack.c.bf16 %v284_v25, %v283_v24  ;;  %v286_v28 = vld [vmem:[#allocation8 + $0x18] sm:$0xff]  ;;  %v374_v39 = vld [vmem:[#allocation10] sm:$0xff]  ;;  %v375_v40 = vld [vmem:[#allocation10 + $0x8] sm:$0xff] }
  0x5f   :  { %577 = vmatprep.subr.bf16.mxu1 %v768_v0  ;;  %v584_v29 = vpack.c.bf16 %v286_v28, %v285_v27  ;;  %v484_v30 = vld [vmem:[%s939_s4] ss:$0 sm:$0xff]  ;;  %v587_v41 = vpack.c.bf16 %v375_v40, %v374_v39  ;;  %v376_v42 = vld [vmem:[#allocation10 + $0x10] sm:$0xff]  ;;  %v378_v45 = vld [vmem:[#allocation10 + $0x20] sm:$0xff] }
  0x60   :  { %v377_v43 = vld [vmem:[#allocation10 + $0x18] sm:$0xff]  ;;  %v379_v46 = vld [vmem:[#allocation10 + $0x28] sm:$0xff]  ;;  %v380_v48 = vld [vmem:[#allocation10 + $0x30] sm:$0xff] }
  0x61   :  { %573 = vmatpush3.bf16.msra.mxu0 %v572_v7  ;;  %v590_v44 = vpack.c.bf16 %v377_v43, %v376_v42  ;;  %v593_v47 = vpack.c.bf16 %v379_v46, %v378_v45  ;;  %v381_v49 = vld [vmem:[#allocation10 + $0x38] sm:$0xff] }
  0x62   :  { %580 = vmatprep.subr.bf16.mxu0 %v768_v0  ;;  %579 = vmatpush3.bf16.msra.mxu1 %v578_v14  ;;  %v596_v50 = vpack.c.bf16 %v381_v49, %v380_v48  ;;  %v487_v51 = vld [vmem:[%s941_s6] ss:$0 sm:$0xff]  ;;  %s731_s6 = scalar_lea.vmem %s471_s12, 128 }
  0x63   :  { %586 = vmatprep.subr.bf16.mxu1 %v768_v0  ;;  %v490_v60 = vld [vmem:[%s943_s8] ss:$0 sm:$0xff]  ;;  %p732_p12 = scmp.ne.s32.totalorder %s471_s12, %s731_s6  ;;  %p737_p0 = scmp.lt.s32.totalorder %s731_s6, %s731_s6 }
  0x64   :  { %525 = vmatmul.mubr.msk.f32.vlgmr.msra.gmra.mrb[0].mxu0 %vm111_vm1, %v99_v8 }
  0x65   :  { %546 = vmatprep.mubr.msk.f32.mxu0 %vm769_vm0, %v770_v1  ;;  %582 = vmatpush3.bf16.msra.mxu0 %v581_v26  ;;  %p738_p1 = por %p737_p0, %p736_p13 }
  0x66   :  { %583 = vmatprep.subr.bf16.mxu0 %v768_v0 }
  0x67   :  { %p739_p2 = pnand %p738_p1, %p732_p12 }
  0x69   :  { %585 = vmatpush3.bf16.msra.mxu0 %v584_v29 }
 0x137   :  { %v181_v16 = vpop.f32.mrb[0].mxu0 }
 0x138   :  { %v182_v17 = vadd.f32 %v481_v15, %v181_v16  ;;  %v526_v18 = vpop.f32.mrb[1].mxu0 }
 0x13a   :  { %v483_v19 = vmul.f32 -1.442695, %v182_v17 }
 0x13c   :  { %609 = vpow2.f32 %v483_v19 }
 0x146   :  { %v610_v20 = vpop.eup %609 }
 0x147   :  { %v188_v21 = vadd.f32 1.0, %v610_v20 }
 0x149   :  { %611 = vrcp.f32 %v188_v21 }
 0x153   :  { %v612_v22 = vpop.eup %611 }
 0x154   :  { %v191_v23 = vmul.f32 %v612_v22, %v182_v17 }
 0x156   :  { %536 = vmatmul.mubr.msk.f32.vlgmr.msra.gmra.mrb[0].mxu1 %vm111_vm1, %v191_v23 }
 0x157   :  { %565 = vmatprep.mubr.msk.f32.mxu1 %vm769_vm0, %v770_v1  ;;  %588 = vmatpush3.bf16.msra.mxu1 %v587_v41 }
 0x158   :  { %589 = vmatprep.subr.bf16.mxu1 %v768_v0 }
 0x15b   :  { %591 = vmatpush3.bf16.msra.mxu1 %v590_v44 }
 0x15c   :  { %592 = vmatprep.subr.bf16.mxu1 %v768_v0 }
 0x15f   :  { %594 = vmatpush3.bf16.msra.mxu1 %v593_v47 }
 0x160   :  { %595 = vmatprep.subr.bf16.mxu1 %v768_v0 }
 0x163   :  { %597 = vmatpush3.bf16.msra.mxu1 %v596_v50 }
 0x229   :  { %v272_v31 = vpop.f32.mrb[0].mxu1 }
 0x22a   :  { %v273_v32 = vadd.f32 %v484_v30, %v272_v31  ;;  %v537_v33 = vpop.f32.mrb[1].mxu1 }
 0x22c   :  { %v486_v34 = vmul.f32 -1.442695, %v273_v32 }
 0x22e   :  { %613 = vpow2.f32 %v486_v34 }
 0x238   :  { %v614_v35 = vpop.eup %613 }
 0x239   :  { %v279_v36 = vadd.f32 1.0, %v614_v35 }
 0x23b   :  { %615 = vrcp.f32 %v279_v36 }
 0x245   :  { %v616_v37 = vpop.eup %615 }
 0x246   :  { %v282_v38 = vmul.f32 %v616_v37, %v273_v32 }
 0x248   :  { %547 = vmatmul.mubr.msk.f32.vlgmr.msra.gmra.mrb[2].mxu0 %vm111_vm1, %v282_v38 }
 0x31b   :  { %v363_v52 = vpop.f32.mrb[2].mxu0 }
 0x31c   :  { %v364_v53 = vadd.f32 %v487_v51, %v363_v52  ;;  %v548_v54 = vpop.f32.mrb[3].mxu0 }
 0x31e   :  { %v489_v55 = vmul.f32 -1.442695, %v364_v53 }
 0x320   :  { %617 = vpow2.f32 %v489_v55 }
 0x32a   :  { %v618_v56 = vpop.eup %617 }
 0x32b   :  { %v370_v57 = vadd.f32 1.0, %v618_v56 }
 0x32d   :  { %619 = vrcp.f32 %v370_v57 }
 0x337   :  { %v620_v58 = vpop.eup %619 }
 0x338   :  { %v373_v59 = vmul.f32 %v620_v58, %v364_v53 }
 0x33a   :  { %566 = vmatmul.mubr.msk.f32.vlgmr.msra.gmra.mrb[2].mxu1 %vm389_vm2, %v373_v59 }
 0x40d   :  { %v459_v61 = vpop.f32.mrb[2].mxu1 }
 0x40e   :  { %v460_v62 = vadd.f32 %v490_v60, %v459_v61  ;;  %v567_v63 = vpop.f32.mrb[3].mxu1 }
 0x410   :  { %463 = vst [vmem:[#allocation11] sm:$0xff] %v460_v62 }
 0x411   :  { %742 = shalt.err (!%p739_p2)
}
 0x412   :  { %s743_s10 = scalar_lea.hbm %s944_s9, 128 }
 0x413   :  { %p744_p3 = scmp.ne.s32.totalorder %s944_s9, %s743_s10  ;;  %p747_p4 = scmp.lt.u32.totalorder %s743_s10, %s944_s9 }
 0x415   :  { %p749_p5 = pnand %p747_p4, %p744_p3 }
 0x417   :  { %752 = shalt.err (!%p749_p5)
}
 0x418   :  { %473 = dma.vmem_to_hbm [thread:$0]  %s471_s12, 128, %s944_s9, [#allocation4]  }
 0x419   :  { %759 = dma.done.wait [#allocation4], 128  }
 0x41a   :  { %760 = vsyncadd [#allocation4], 4294967168 }
 0x41b   :  { %477 = vsyncpa [#allocation3], 1 }
 0x41c   :  { %478 = vsyncpa [#allocation6], 1 }
 0x41d   :  { %479 = vsyncpa [#allocation9], 1 }
 0x41e   :  { %480 = vsyncpa [#allocation4], 1 }

</bundles_post_ra>
